<compile_context>
chip_gen: v7x
topology: tpu7x:2x2x1
jax: 0.10.0
libtpu: 0.0.40
codegen_flags: <defaults>
</compile_context>

<pallas_src>
import functools

import jax
import jax.numpy as jnp
from jax.experimental import pallas as pl
from jax.experimental.pallas import tpu as pltpu


def _round_up(x: int, m: int) -> int:
    return ((x + m - 1) // m) * m


# ---------------------------------------------------------------------------
# Exact GELU via Abramowitz & Stegun 7.1.26 erf approximation (|err| < 1.5e-7).
# Avoids relying on an erf lowering rule in Mosaic; uses only exp/abs/where.
# ---------------------------------------------------------------------------
_INV_SQRT2 = 0.7071067811865476


def _erf(x):
    a1, a2, a3, a4, a5 = (0.254829592, -0.284496736, 1.421413741,
                          -1.453152027, 1.061405429)
    p = 0.3275911
    sign = jnp.where(x >= 0.0, 1.0, -1.0)
    ax = jnp.abs(x)
    t = 1.0 / (1.0 + p * ax)
    poly = ((((a5 * t + a4) * t + a3) * t + a2) * t + a1) * t
    return sign * (1.0 - poly * jnp.exp(-ax * ax))


def _gelu(x):
    return 0.5 * x * (1.0 + _erf(x * _INV_SQRT2))


# ---------------------------------------------------------------------------
# Kernel
# ---------------------------------------------------------------------------
def _lm_head_kernel(x_ref, wd_ref, bd_ref, g_ref, b_ref, wdec_ref, bias_ref,
                    out_ref, h_scr, *, eps):
    # Compute dense -> GELU -> LayerNorm once per token tile (vocab program 0)
    # into a bf16 VMEM scratch; reuse it for every vocab tile.
    @pl.when(pl.program_id(1) == 0)
    def _():
        h = jnp.dot(x_ref[...], wd_ref[...],
                    preferred_element_type=jnp.float32)          # [TN, H] f32
        h = _gelu(h + bd_ref[...])
        mean = jnp.mean(h, axis=-1, keepdims=True)
        c = h - mean
        var = jnp.mean(c * c, axis=-1, keepdims=True)
        h = c * jax.lax.rsqrt(var + eps)
        h = h * g_ref[...] + b_ref[...]
        h_scr[...] = h.astype(h_scr.dtype)                       # -> bf16

    logits = jnp.dot(h_scr[...], wdec_ref[...],
                     preferred_element_type=jnp.float32)         # [TN, TV] f32
    out_ref[...] = (logits + bias_ref[...]).astype(out_ref.dtype)


# ---------------------------------------------------------------------------
# Wrapper
# ---------------------------------------------------------------------------
def roberta_lm_head(features, params, *, eps=1e-5,
                    token_tile=256, vocab_tile=512):
    """RobertaLMHead forward: decoder(layer_norm(gelu(dense(features)))) + bias.

    features : [..., H]
    params:
      w_dense [H, H]   (transposed to [in, out] from PyTorch [out, in])
      b_dense [H]
      ln_gamma [H], ln_beta [H]
      w_dec   [H, V]   (transposed from PyTorch [V, H])
      bias    [V]
    returns logits [..., V] float32
    """
    lead = features.shape[:-1]
    H = features.shape[-1]
    V = params["w_dec"].shape[-1]

    x = features.reshape(-1, H).astype(jnp.bfloat16)   # bf16 activations
    N = x.shape[0]

    # Sublane-aligned token tile, lane-dense (>=128) vocab tile.
    TN = min(token_tile, _round_up(N, 8))
    Np = _round_up(N, TN)
    TV = min(vocab_tile, _round_up(V, 128))
    Vp = _round_up(V, TV)

    if Np != N:
        x = jnp.pad(x, ((0, Np - N), (0, 0)))

    w_dense = params["w_dense"].astype(jnp.bfloat16)
    b_dense = params["b_dense"].reshape(1, H).astype(jnp.float32)
    gamma = params["ln_gamma"].reshape(1, H).astype(jnp.float32)
    beta = params["ln_beta"].reshape(1, H).astype(jnp.float32)
    w_dec = params["w_dec"].astype(jnp.bfloat16)
    bias = params["bias"].reshape(1, V).astype(jnp.float32)
    if Vp != V:
        w_dec = jnp.pad(w_dec, ((0, 0), (0, Vp - V)))
        bias = jnp.pad(bias, ((0, 0), (0, Vp - V)))

    grid = (Np // TN, Vp // TV)

    out = pl.pallas_call(
        functools.partial(_lm_head_kernel, eps=eps),
        out_shape=jax.ShapeDtypeStruct((Np, Vp), jnp.float32),
        grid=grid,
        in_specs=[
            pl.BlockSpec((TN, H), lambda i, j: (i, 0)),   # activations per token tile
            pl.BlockSpec((H, H), lambda i, j: (0, 0)),    # w_dense: VMEM-resident
            pl.BlockSpec((1, H), lambda i, j: (0, 0)),    # b_dense
            pl.BlockSpec((1, H), lambda i, j: (0, 0)),    # ln gamma
            pl.BlockSpec((1, H), lambda i, j: (0, 0)),    # ln beta
            pl.BlockSpec((H, TV), lambda i, j: (0, j)),   # decoder weight per vocab tile
            pl.BlockSpec((1, TV), lambda i, j: (0, j)),   # decoder bias per vocab tile
        ],
        out_specs=pl.BlockSpec((TN, TV), lambda i, j: (i, j)),
        scratch_shapes=[pltpu.VMEM((TN, H), jnp.bfloat16)],
        compiler_params=pltpu.CompilerParams(
            # token tiles independent (shardable across v7x's 2 TCs);
            # vocab tiles sequential per token tile (scratch reuse).
            dimension_semantics=("parallel", "arbitrary"),
        ),
    )(x, w_dense, b_dense, gamma, beta, w_dec, bias)

    out = out[:N, :V]
    return out.reshape(*lead, V)


# ---------------------------------------------------------------------------
# Parameter init (PyTorch Linear-style) and pure-JAX reference
# ---------------------------------------------------------------------------
def init_params(key, hidden, vocab):
    ks = jax.random.split(key, 4)
    bound = 1.0 / jnp.sqrt(hidden)
    w_dense = jax.random.uniform(ks[0], (hidden, hidden), jnp.float32, -bound, bound)
    b_dense = jax.random.uniform(ks[1], (hidden,), jnp.float32, -bound, bound)
    w_dec = jax.random.uniform(ks[2], (hidden, vocab), jnp.float32, -bound, bound)
    # The module inits `self.bias` to zeros; use small random values here so
    # the bias-add path is actually exercised by the check.
    bias = 0.02 * jax.random.normal(ks[3], (vocab,), jnp.float32)
    return {
        "w_dense": w_dense, "b_dense": b_dense,
        "ln_gamma": jnp.ones((hidden,), jnp.float32),
        "ln_beta": jnp.zeros((hidden,), jnp.float32),
        "w_dec": w_dec, "bias": bias,
    }


def reference(features, params, eps):
    H = features.shape[-1]
    x = features.reshape(-1, H).astype(jnp.bfloat16)
    h = jnp.dot(x, params["w_dense"].astype(jnp.bfloat16),
                preferred_element_type=jnp.float32) + params["b_dense"][None, :]
    h = jax.nn.gelu(h, approximate=False)
    mean = jnp.mean(h, axis=-1, keepdims=True)
    var = jnp.mean((h - mean) ** 2, axis=-1, keepdims=True)
    h = (h - mean) * jax.lax.rsqrt(var + eps)
    h = h * params["ln_gamma"][None, :] + params["ln_beta"][None, :]
    h = h.astype(jnp.bfloat16)
    logits = jnp.dot(h, params["w_dec"].astype(jnp.bfloat16),
                     preferred_element_type=jnp.float32) + params["bias"][None, :]
    return logits.reshape(*features.shape[:-1], -1)


if __name__ == "__main__":
    key = jax.random.PRNGKey(0)
    k_x, k_p = jax.random.split(key)

    B, S, H, V = 2, 8, 256, 512   # small, TPU-tiling-friendly shapes
    eps = 1e-5

    features = jax.random.normal(k_x, (B, S, H), dtype=jnp.float32)
    params = init_params(k_p, H, V)

    logits = roberta_lm_head(features, params, eps=eps)
    logits = jax.block_until_ready(logits)
    assert logits.shape == (B, S, V)

    ref = reference(features, params, eps)
    max_err = float(jnp.max(jnp.abs(logits - ref)))
    assert jnp.allclose(logits, ref, atol=1e-2, rtol=1e-2), max_err

    print("KERNEL_OK")
</pallas_src>

<mosaic_0001>
module attributes {stable_mosaic.version = 11 : i64} {
  func.func @_lm_head_kernel(%arg0: i32, %arg1: i32, %arg2: memref<16x256xbf16, #tpu.memory_space<vmem>>, %arg3: memref<256x256xbf16, #tpu.memory_space<vmem>>, %arg4: memref<1x256xf32, #tpu.memory_space<vmem>>, %arg5: memref<1x256xf32, #tpu.memory_space<vmem>>, %arg6: memref<1x256xf32, #tpu.memory_space<vmem>>, %arg7: memref<256x512xbf16, #tpu.memory_space<vmem>>, %arg8: memref<1x512xf32, #tpu.memory_space<vmem>>, %arg9: memref<16x512xf32, #tpu.memory_space<vmem>>, %arg10: memref<16x256xbf16, #tpu.memory_space<vmem>>) attributes {dimension_semantics = [#tpu.dimension_semantics<parallel>, #tpu.dimension_semantics<arbitrary>], iteration_bounds = array<i64: 1, 1>, scalar_prefetch = 0 : i64, scratch_operands = 1 : i64, tpu.core_type = #tpu.core_type<tc>, window_params = [{transform_indices = @transform_0, window_bounds = array<i64: 16, 256>}, {pipeline_mode = #tpu.pipeline_mode<synchronous>, transform_indices = @transform_1, window_bounds = array<i64: 256, 256>}, {pipeline_mode = #tpu.pipeline_mode<synchronous>, transform_indices = @transform_2, window_bounds = array<i64: 1, 256>}, {pipeline_mode = #tpu.pipeline_mode<synchronous>, transform_indices = @transform_3, window_bounds = array<i64: 1, 256>}, {pipeline_mode = #tpu.pipeline_mode<synchronous>, transform_indices = @transform_4, window_bounds = array<i64: 1, 256>}, {transform_indices = @transform_5, window_bounds = array<i64: 256, 512>}, {transform_indices = @transform_6, window_bounds = array<i64: 1, 512>}, {transform_indices = @transform_7, window_bounds = array<i64: 16, 512>}]} {
    %c0_i32 = arith.constant 0 : i32
    %0 = arith.cmpi eq, %arg1, %c0_i32 : i32
    %1 = arith.extui %0 : i1 to i32
    %c0_i32_0 = arith.constant 0 : i32
    %2 = arith.cmpi ne, %1, %c0_i32_0 : i32
    scf.if %2 {
      %c0_8 = arith.constant 0 : index
      %c0_9 = arith.constant 0 : index
      %10 = vector.load %arg2[%c0_8, %c0_9] : memref<16x256xbf16, #tpu.memory_space<vmem>>, vector<16x256xbf16>
      %c0_10 = arith.constant 0 : index
      %c0_11 = arith.constant 0 : index
      %11 = vector.load %arg3[%c0_10, %c0_11] : memref<256x256xbf16, #tpu.memory_space<vmem>>, vector<256x256xbf16>
      %cst_12 = arith.constant dense<0.000000e+00> : vector<16x256xf32>
      %12 = tpu.matmul %10, %11, %cst_12 {dimension_numbers = #tpu.dot_dimension_numbers<[1], [0], [0], [1], [0, 0, 1, 1], [], []>} : vector<16x256xbf16>, vector<256x256xbf16>, vector<16x256xf32> -> vector<16x256xf32>
      %c0_13 = arith.constant 0 : index
      %c0_14 = arith.constant 0 : index
      %13 = vector.load %arg4[%c0_13, %c0_14] : memref<1x256xf32, #tpu.memory_space<vmem>>, vector<1x256xf32>
      %14 = vector.broadcast %13 : vector<1x256xf32> to vector<16x256xf32>
      %15 = arith.addf %12, %14 : vector<16x256xf32>
      %cst_15 = arith.constant 5.000000e-01 : f32
      %16 = vector.broadcast %cst_15 : f32 to vector<16x256xf32>
      %17 = arith.mulf %16, %15 : vector<16x256xf32>
      %cst_16 = arith.constant 0.707106769 : f32
      %18 = vector.broadcast %cst_16 : f32 to vector<16x256xf32>
      %19 = arith.mulf %15, %18 : vector<16x256xf32>
      %cst_17 = arith.constant 0.000000e+00 : f32
      %20 = vector.broadcast %cst_17 : f32 to vector<16x256xf32>
      %21 = arith.cmpf oge, %19, %20 : vector<16x256xf32>
      %cst_18 = arith.constant 1.000000e+00 : f32
      %cst_19 = arith.constant -1.000000e+00 : f32
      %22 = vector.broadcast %cst_18 : f32 to vector<16x256xf32>
      %23 = vector.broadcast %cst_19 : f32 to vector<16x256xf32>
      %24 = arith.select %21, %22, %23 : vector<16x256xi1>, vector<16x256xf32>
      %25 = math.absf %19 : vector<16x256xf32>
      %cst_20 = arith.constant 0.327591091 : f32
      %26 = vector.broadcast %cst_20 : f32 to vector<16x256xf32>
      %27 = arith.mulf %26, %25 : vector<16x256xf32>
      %cst_21 = arith.constant 1.000000e+00 : f32
      %28 = vector.broadcast %cst_21 : f32 to vector<16x256xf32>
      %29 = arith.addf %28, %27 : vector<16x256xf32>
      %cst_22 = arith.constant 1.000000e+00 : f32
      %30 = vector.broadcast %cst_22 : f32 to vector<16x256xf32>
      %31 = arith.divf %30, %29 : vector<16x256xf32>
      %cst_23 = arith.constant 1.06140542 : f32
      %32 = vector.broadcast %cst_23 : f32 to vector<16x256xf32>
      %33 = arith.mulf %32, %31 : vector<16x256xf32>
      %cst_24 = arith.constant -1.45315206 : f32
      %34 = vector.broadcast %cst_24 : f32 to vector<16x256xf32>
      %35 = arith.addf %33, %34 : vector<16x256xf32>
      %36 = arith.mulf %35, %31 : vector<16x256xf32>
      %cst_25 = arith.constant 1.42141378 : f32
      %37 = vector.broadcast %cst_25 : f32 to vector<16x256xf32>
      %38 = arith.addf %36, %37 : vector<16x256xf32>
      %39 = arith.mulf %38, %31 : vector<16x256xf32>
      %cst_26 = arith.constant -0.284496725 : f32
      %40 = vector.broadcast %cst_26 : f32 to vector<16x256xf32>
      %41 = arith.addf %39, %40 : vector<16x256xf32>
      %42 = arith.mulf %41, %31 : vector<16x256xf32>
      %cst_27 = arith.constant 0.254829586 : f32
      %43 = vector.broadcast %cst_27 : f32 to vector<16x256xf32>
      %44 = arith.addf %42, %43 : vector<16x256xf32>
      %45 = arith.mulf %44, %31 : vector<16x256xf32>
      %cst_28 = arith.constant 0.000000e+00 : f32
      %46 = vector.broadcast %cst_28 : f32 to vector<16x256xf32>
      %47 = arith.subf %46, %25 : vector<16x256xf32>
      %48 = arith.mulf %47, %25 : vector<16x256xf32>
      %49 = math.exp %48 : vector<16x256xf32>
      %50 = arith.mulf %45, %49 : vector<16x256xf32>
      %cst_29 = arith.constant 1.000000e+00 : f32
      %51 = vector.broadcast %cst_29 : f32 to vector<16x256xf32>
      %52 = arith.subf %51, %50 : vector<16x256xf32>
      %53 = arith.mulf %24, %52 : vector<16x256xf32>
      %cst_30 = arith.constant 1.000000e+00 : f32
      %54 = vector.broadcast %cst_30 : f32 to vector<16x256xf32>
      %55 = arith.addf %54, %53 : vector<16x256xf32>
      %56 = arith.mulf %17, %55 : vector<16x256xf32>
      %cst_31 = arith.constant dense<0.000000e+00> : vector<16xf32>
      %57 = vector.multi_reduction <add>, %56, %cst_31 [1] : vector<16x256xf32> to vector<16xf32>
      %58 = vector.shape_cast %57 : vector<16xf32> to vector<16x1xf32>
      %cst_32 = arith.constant 2.560000e+02 : f32
      %59 = vector.broadcast %cst_32 : f32 to vector<16x1xf32>
      %60 = arith.divf %58, %59 : vector<16x1xf32>
      %61 = vector.broadcast %60 : vector<16x1xf32> to vector<16x256xf32>
      %62 = arith.subf %56, %61 : vector<16x256xf32>
      %63 = arith.mulf %62, %62 : vector<16x256xf32>
      %cst_33 = arith.constant dense<0.000000e+00> : vector<16xf32>
      %64 = vector.multi_reduction <add>, %63, %cst_33 [1] : vector<16x256xf32> to vector<16xf32>
      %65 = vector.shape_cast %64 : vector<16xf32> to vector<16x1xf32>
      %cst_34 = arith.constant 2.560000e+02 : f32
      %66 = vector.broadcast %cst_34 : f32 to vector<16x1xf32>
      %67 = arith.divf %65, %66 : vector<16x1xf32>
      %cst_35 = arith.constant 9.99999974E-6 : f32
      %68 = vector.broadcast %cst_35 : f32 to vector<16x1xf32>
      %69 = arith.addf %67, %68 : vector<16x1xf32>
      %70 = math.rsqrt %69 : vector<16x1xf32>
      %71 = vector.broadcast %70 : vector<16x1xf32> to vector<16x256xf32>
      %72 = arith.mulf %62, %71 : vector<16x256xf32>
      %c0_36 = arith.constant 0 : index
      %c0_37 = arith.constant 0 : index
      %73 = vector.load %arg5[%c0_36, %c0_37] : memref<1x256xf32, #tpu.memory_space<vmem>>, vector<1x256xf32>
      %74 = vector.broadcast %73 : vector<1x256xf32> to vector<16x256xf32>
      %75 = arith.mulf %72, %74 : vector<16x256xf32>
      %c0_38 = arith.constant 0 : index
      %c0_39 = arith.constant 0 : index
      %76 = vector.load %arg6[%c0_38, %c0_39] : memref<1x256xf32, #tpu.memory_space<vmem>>, vector<1x256xf32>
      %77 = vector.broadcast %76 : vector<1x256xf32> to vector<16x256xf32>
      %78 = arith.addf %75, %77 : vector<16x256xf32>
      %79 = arith.truncf %78 : vector<16x256xf32> to vector<16x256xbf16>
      %c0_40 = arith.constant 0 : index
      %c0_41 = arith.constant 0 : index
      %80 = vector.load %arg10[%c0_40, %c0_41] : memref<16x256xbf16, #tpu.memory_space<vmem>>, vector<16x256xbf16>
      tpu.vector_store %arg10[%c0_40, %c0_41], %79 {strides = array<i32>} : memref<16x256xbf16, #tpu.memory_space<vmem>>, vector<16x256xbf16>,
    } else {
    }
    %c0 = arith.constant 0 : index
    %c0_1 = arith.constant 0 : index
    %3 = vector.load %arg10[%c0, %c0_1] : memref<16x256xbf16, #tpu.memory_space<vmem>>, vector<16x256xbf16>
    %c0_2 = arith.constant 0 : index
    %c0_3 = arith.constant 0 : index
    %4 = vector.load %arg7[%c0_2, %c0_3] : memref<256x512xbf16, #tpu.memory_space<vmem>>, vector<256x512xbf16>
    %cst = arith.constant dense<0.000000e+00> : vector<16x512xf32>
    %5 = tpu.matmul %3, %4, %cst {dimension_numbers = #tpu.dot_dimension_numbers<[1], [0], [0], [1], [0, 0, 1, 1], [], []>} : vector<16x256xbf16>, vector<256x512xbf16>, vector<16x512xf32> -> vector<16x512xf32>
    %c0_4 = arith.constant 0 : index
    %c0_5 = arith.constant 0 : index
    %6 = vector.load %arg8[%c0_4, %c0_5] : memref<1x512xf32, #tpu.memory_space<vmem>>, vector<1x512xf32>
    %7 = vector.broadcast %6 : vector<1x512xf32> to vector<16x512xf32>
    %8 = arith.addf %5, %7 : vector<16x512xf32>
    %c0_6 = arith.constant 0 : index
    %c0_7 = arith.constant 0 : index
    %9 = vector.load %arg9[%c0_6, %c0_7] : memref<16x512xf32, #tpu.memory_space<vmem>>, vector<16x512xf32>
    tpu.vector_store %arg9[%c0_6, %c0_7], %8 {strides = array<i32>} : memref<16x512xf32, #tpu.memory_space<vmem>>, vector<16x512xf32>,
    return
  }
  func.func @transform_0(%arg0: i32, %arg1: i32) -> (i32, i32) {
    %c0_i32 = arith.constant 0 : i32
    %c0_i32_0 = arith.constant 0 : i32
    return %arg0, %c0_i32 : i32, i32
  }
  func.func @transform_1(%arg0: i32, %arg1: i32) -> (i32, i32) {
    %c0_i32 = arith.constant 0 : i32
    %c0_i32_0 = arith.constant 0 : i32
    %c0_i32_1 = arith.constant 0 : i32
    return %c0_i32, %c0_i32_0 : i32, i32
  }
  func.func @transform_2(%arg0: i32, %arg1: i32) -> (i32, i32) {
    %c0_i32 = arith.constant 0 : i32
    %c0_i32_0 = arith.constant 0 : i32
    %c0_i32_1 = arith.constant 0 : i32
    return %c0_i32, %c0_i32_0 : i32, i32
  }
  func.func @transform_3(%arg0: i32, %arg1: i32) -> (i32, i32) {
    %c0_i32 = arith.constant 0 : i32
    %c0_i32_0 = arith.constant 0 : i32
    %c0_i32_1 = arith.constant 0 : i32
    return %c0_i32, %c0_i32_0 : i32, i32
  }
  func.func @transform_4(%arg0: i32, %arg1: i32) -> (i32, i32) {
    %c0_i32 = arith.constant 0 : i32
    %c0_i32_0 = arith.constant 0 : i32
    %c0_i32_1 = arith.constant 0 : i32
    return %c0_i32, %c0_i32_0 : i32, i32
  }
  func.func @transform_5(%arg0: i32, %arg1: i32) -> (i32, i32) {
    %c0_i32 = arith.constant 0 : i32
    %c0_i32_0 = arith.constant 0 : i32
    return %c0_i32, %arg1 : i32, i32
  }
  func.func @transform_6(%arg0: i32, %arg1: i32) -> (i32, i32) {
    %c0_i32 = arith.constant 0 : i32
    %c0_i32_0 = arith.constant 0 : i32
    return %c0_i32, %arg1 : i32, i32
  }
  func.func @transform_7(%arg0: i32, %arg1: i32) -> (i32, i32) {
    %c0_i32 = arith.constant 0 : i32
    return %arg0, %arg1 : i32, i32
  }
}

</mosaic_0001>

<bundles_post_ra>
// kernel: tpu_custom_call.1
= control target key start
LH: loop header
LB: loop body
LE: loop exit
PB: predicated region body
PF: predicated region fallthrough
CT: control target
= control target key end

     0   :  { %12 = vsyncpa [#allocation4], 0  ;;  %s1604_s0 = inlined_call_operand.hbm [shape: bf16[16,256], index: 0, kind: input, shape index: {}]   ;;  %s1605_s1 = inlined_call_operand.hbm [shape: bf16[256,256], index: 1, kind: input, shape index: {}]   ;;  %s1606_s2 = inlined_call_operand.vmem [shape: f32[1,256], index: 2, kind: input, shape index: {}]   ;;  %s1607_s3 = inlined_call_operand.vmem [shape: f32[1,256], index: 3, kind: input, shape index: {}]   ;;  %s1608_s4 = inlined_call_operand.vmem [shape: f32[1,256], index: 4, kind: input, shape index: {}]   ;;  %s1609_s5 = inlined_call_operand.hbm [shape: bf16[256,512], index: 5, kind: input, shape index: {}]   ;;  %s1610_s6 = inlined_call_operand.vmem [shape: f32[1,512], index: 6, kind: input, shape index: {}]   ;;  %s1611_s7 = inlined_call_operand.hbm [shape: f32[16,512], index: 7, kind: output, shape index: {}]  }
   0x1   :  { %13 = vsyncpa [#allocation7], 0 }
   0x2   :  { %14 = vsyncpa [#allocation5], 0  ;;  %s1398_s24 = smov [#allocation6]   ;;  %s1399_s26 = smov [#allocation3]  }
   0x3   :  { %s32_s25 = sshll.u32 %s1398_s24, 4  ;;  %s20_s27 = sshll.u32 %s1399_s26, 4  ;;  %s33_s25 = int_to_ptr.vmem [resolvable:$true] %s32_s25  ;;  %s1449_s27 = int_to_ptr.vmem [resolvable:$true] %s20_s27 }
   0x4   :  { %s1304_s30 = scalar_lea.hbm %s1605_s1, 4096 }
   0x5   :  { %p1305_p0 = scmp.ne.s32.totalorder %s1605_s1, %s1304_s30  ;;  %p1308_p1 = scmp.lt.u32.totalorder %s1304_s30, %s1605_s1 }
   0x7   :  { %p1310_p2 = pnand %p1308_p1, %p1305_p0 }
   0x9   :  { %1313 = shalt.err (!%p1310_p2)
}
   0xa   :  { %s1314_s12 = scalar_lea.vmem %s33_s25, 4096  ;;  %p1319_p4 = scmp.lt.s32.totalorder %s33_s25, %s33_s25 }
   0xb   :  { %p1315_p3 = scmp.ne.s32.totalorder %s33_s25, %s1314_s12  ;;  %p1320_p5 = scmp.lt.s32.totalorder %s1314_s12, %s1314_s12 }
   0xd   :  { %p1321_p6 = por %p1320_p5, %p1319_p4 }
   0xf   :  { %p1322_p7 = pnand %p1321_p6, %p1315_p3 }
  0x11   :  { %1325 = shalt.err (!%p1322_p7)
}
  0x12   :  { %s1400_s13 = smov 128   ;;  %s1401_s14 = smov 8  }
  0x13   :  { %38 = dma.hbm_to_vmem [thread:$0]  %s1605_s1, 4096, %s33_s25, [#allocation7], %s1400_s13, %s1400_s13, %s1401_s14  }
  0x14   :  { %s1326_s19 = scalar_lea.hbm %s1604_s0, 256 }
  0x15   :  { %p1327_p8 = scmp.ne.s32.totalorder %s1604_s0, %s1326_s19  ;;  %p1330_p9 = scmp.lt.u32.totalorder %s1326_s19, %s1604_s0 }
  0x17   :  { %p1332_p10 = pnand %p1330_p9, %p1327_p8 }
  0x19   :  { %1335 = shalt.err (!%p1332_p10)
}
  0x1a   :  { %s1336_s24 = scalar_lea.vmem %s1449_s27, 256  ;;  %p1341_p12 = scmp.lt.s32.totalorder %s1449_s27, %s1449_s27 }
  0x1b   :  { %p1337_p11 = scmp.ne.s32.totalorder %s1449_s27, %s1336_s24  ;;  %p1342_p13 = scmp.lt.s32.totalorder %s1336_s24, %s1336_s24 }
  0x1d   :  { %p1343_p0 = por %p1342_p13, %p1341_p12 }
  0x1f   :  { %p1344_p1 = pnand %p1343_p0, %p1337_p11 }
  0x21   :  { %1347 = shalt.err (!%p1344_p1)
}
  0x22   :  { %26 = dma.hbm_to_vmem [thread:$0]  %s1604_s0, 256, %s1449_s27, [#allocation4], %s1400_s13, %s1400_s13, %s1401_s14  }
  0x23   :  { %s1402_s26 = smov [#allocation8]   ;;  %s1348_s8 = scalar_lea.hbm %s1609_s5, 8192 }
  0x24   :  { %s50_s28 = sshll.u32 %s1402_s26, 4  ;;  %p1349_p2 = scmp.ne.s32.totalorder %s1609_s5, %s1348_s8  ;;  %s51_s28 = int_to_ptr.vmem [resolvable:$true] %s50_s28 }
  0x25   :  { %p1352_p3 = scmp.lt.u32.totalorder %s1348_s8, %s1609_s5 }
  0x27   :  { %p1354_p4 = pnand %p1352_p3, %p1349_p2 }
  0x29   :  { %1357 = shalt.err (!%p1354_p4)
}
  0x2a   :  { %s1358_s15 = scalar_lea.vmem %s51_s28, 8192  ;;  %p1363_p6 = scmp.lt.s32.totalorder %s51_s28, %s51_s28 }
  0x2b   :  { %p1359_p5 = scmp.ne.s32.totalorder %s51_s28, %s1358_s15  ;;  %p1364_p7 = scmp.lt.s32.totalorder %s1358_s15, %s1358_s15 }
  0x2d   :  { %p1365_p8 = por %p1364_p7, %p1363_p6 }
  0x2f   :  { %p1366_p9 = pnand %p1365_p8, %p1359_p5 }
  0x31   :  { %1369 = shalt.err (!%p1366_p9)
}
  0x32   :  { %s1403_s0 = smov 256   ;;  %s1404_s27 = smov 16  }
  0x33   :  { %56 = dma.hbm_to_vmem [thread:$0]  %s1609_s5, 8192, %s51_s28, [#allocation7], %s1403_s0, %s1403_s0, %s1404_s27  }
  0x34   :  { %1392 = dma.done.wait [#allocation4], 256  }
  0x35   :  { %1393 = vsyncadd [#allocation4], 4294967040 }
  0x36   :  { %1394 = dma.done.wait [#allocation7], 12288  }
  0x37   :  { %1395 = vsyncadd [#allocation7], 4294955008  ;;  %v1137_v0 = vld [vmem:[#allocation6 + $0x4] ss:$8 sps:$4 sm:$0xff]   ;;  %v1139_v1 = vld [vmem:[#allocation6] ss:$8 sps:$4 sm:$0xff]   ;;  %v108_v34 = vlaneseq }
  0x38   :  { %288 = vmatprep.subr.bf16.mxu0 %v1137_v0  ;;  %v1140_v2 = vld [vmem:[#allocation6 + $0x14] ss:$8 sps:$4 sm:$0xff]   ;;  %v1142_v3 = vld [vmem:[#allocation6 + $0x10] ss:$8 sps:$4 sm:$0xff]   ;;  %v1143_v4 = vld [vmem:[#allocation6 + $0x24] ss:$8 sps:$4 sm:$0xff]  }
  0x39   :  { %289 = vmatpush1.bf16.msra.mxu0 %v1139_v1  ;;  %v1145_v5 = vld [vmem:[#allocation6 + $0x20] ss:$8 sps:$4 sm:$0xff]   ;;  %v1146_v6 = vld [vmem:[#allocation6 + $0x34] ss:$8 sps:$4 sm:$0xff]   ;;  %v1148_v7 = vld [vmem:[#allocation6 + $0x30] ss:$8 sps:$4 sm:$0xff]  }
  0x3a   :  { %290 = vmatprep.subr.bf16.mxu0 %v1140_v2  ;;  %v1149_v8 = vld [vmem:[#allocation6 + $0x44] ss:$8 sps:$4 sm:$0xff]   ;;  %v1151_v9 = vld [vmem:[#allocation6 + $0x40] ss:$8 sps:$4 sm:$0xff]   ;;  %v1152_v10 = vld [vmem:[#allocation6 + $0x54] ss:$8 sps:$4 sm:$0xff]  }
  0x3b   :  { %v1154_v11 = vld [vmem:[#allocation6 + $0x50] ss:$8 sps:$4 sm:$0xff]   ;;  %v1155_v12 = vld [vmem:[#allocation6 + $0x64] ss:$8 sps:$4 sm:$0xff]   ;;  %v1157_v13 = vld [vmem:[#allocation6 + $0x60] ss:$8 sps:$4 sm:$0xff]  }
  0x3c   :  { %v1158_v14 = vld [vmem:[#allocation6 + $0x74] ss:$8 sps:$4 sm:$0xff]   ;;  %v1160_v16 = vld [vmem:[#allocation6 + $0x70] ss:$8 sps:$4 sm:$0xff]   ;;  %v1161_v17 = vld [vmem:[#allocation6 + $0x84] ss:$8 sps:$4 sm:$0xff]  }
  0x3d   :  { %291 = vmatpush1.bf16.msra.mxu0 %v1142_v3  ;;  %v1187_v15 = vld [vmem:[#allocation3 + $0x4] ss:$8 sps:$4 sm:$0xff]   ;;  %v1163_v18 = vld [vmem:[#allocation6 + $0x80] ss:$8 sps:$4 sm:$0xff]   ;;  %v1166_v20 = vld [vmem:[#allocation6 + $0x90] ss:$8 sps:$4 sm:$0xff]  }
  0x3e   :  { %292 = vmatprep.subr.bf16.mxu0 %v1143_v4  ;;  %320 = vmatprep.mubr.bf16.mxu0 %v1187_v15  ;;  %v1164_v19 = vld [vmem:[#allocation6 + $0x94] ss:$8 sps:$4 sm:$0xff]   ;;  %v1167_v21 = vld [vmem:[#allocation6 + $0xa4] ss:$8 sps:$4 sm:$0xff]   ;;  %v1169_v22 = vld [vmem:[#allocation6 + $0xa0] ss:$8 sps:$4 sm:$0xff]  }
  0x3f   :  { %v1170_v23 = vld [vmem:[#allocation6 + $0xb4] ss:$8 sps:$4 sm:$0xff]   ;;  %v1172_v24 = vld [vmem:[#allocation6 + $0xb0] ss:$8 sps:$4 sm:$0xff]   ;;  %v1173_v25 = vld [vmem:[#allocation6 + $0xc4] ss:$8 sps:$4 sm:$0xff]  }
  0x40   :  { %v1175_v26 = vld [vmem:[#allocation6 + $0xc0] ss:$8 sps:$4 sm:$0xff]   ;;  %v1176_v27 = vld [vmem:[#allocation6 + $0xd4] ss:$8 sps:$4 sm:$0xff]   ;;  %v1178_v28 = vld [vmem:[#allocation6 + $0xd0] ss:$8 sps:$4 sm:$0xff]  }
  0x41   :  { %293 = vmatpush1.bf16.msra.mxu0 %v1145_v5  ;;  %v1179_v29 = vld [vmem:[#allocation6 + $0xe4] ss:$8 sps:$4 sm:$0xff]   ;;  %v1181_v30 = vld [vmem:[#allocation6 + $0xe0] ss:$8 sps:$4 sm:$0xff]   ;;  %v1182_v31 = vld [vmem:[#allocation6 + $0xf4] ss:$8 sps:$4 sm:$0xff]  }
  0x42   :  { %294 = vmatprep.subr.bf16.mxu0 %v1146_v6  ;;  %v1184_v32 = vld [vmem:[#allocation6 + $0xf0] ss:$8 sps:$4 sm:$0xff]   ;;  %v1492_v35 = vshrl.u32 %v108_v34, 7  ;;  %s1406_s20 = smov [#allocation9]  }
  0x43   :  { %v1185_v33 = vld [vmem:[#allocation3] ss:$8 sps:$4 sm:$0xff]   ;;  %s1015_s21 = sshll.u32 %s1406_s20, 4  ;;  %s1016_s21 = int_to_ptr.vmem [resolvable:$true] %s1015_s21 }
  0x44   :  { %v1495_v36 = vsub.s32 0, %v1492_v35  ;;  %v106_v37 = vld [vmem:[%s1606_s2] sm:$0x3]  ;;  %v1501_v38 = vsub.s32 1, %v1492_v35  ;;  %p1375_p11 = scmp.lt.s32.totalorder %s1016_s21, %s1016_s21 }
  0x45   :  { %295 = vmatpush1.bf16.msra.mxu0 %v1148_v7 }
  0x46   :  { %296 = vmatprep.subr.bf16.mxu0 %v1149_v8  ;;  %v111_v39 = vrot.slane %v106_v37, %v1495_v36  ;;  %v115_v40 = vrot.slane %v106_v37, %v1501_v38 }
  0x49   :  { %297 = vmatpush1.bf16.msra.mxu0 %v1151_v9 }
  0x4a   :  { %298 = vmatprep.subr.bf16.mxu0 %v1152_v10 }
  0x4d   :  { %299 = vmatpush1.bf16.msra.mxu0 %v1154_v11 }
  0x4e   :  { %300 = vmatprep.subr.bf16.mxu0 %v1155_v12 }
  0x51   :  { %301 = vmatpush1.bf16.msra.mxu0 %v1157_v13 }
  0x52   :  { %302 = vmatprep.subr.bf16.mxu0 %v1158_v14 }
  0x55   :  { %303 = vmatpush1.bf16.msra.mxu0 %v1160_v16 }
  0x56   :  { %304 = vmatprep.subr.bf16.mxu0 %v1161_v17 }
  0x59   :  { %305 = vmatpush1.bf16.msra.mxu0 %v1163_v18 }
  0x5a   :  { %306 = vmatprep.subr.bf16.mxu0 %v1164_v19 }
  0x5d   :  { %307 = vmatpush1.bf16.msra.mxu0 %v1166_v20 }
  0x5e   :  { %308 = vmatprep.subr.bf16.mxu0 %v1167_v21 }
  0x61   :  { %309 = vmatpush1.bf16.msra.mxu0 %v1169_v22 }
  0x62   :  { %310 = vmatprep.subr.bf16.mxu0 %v1170_v23 }
  0x65   :  { %311 = vmatpush1.bf16.msra.mxu0 %v1172_v24 }
  0x66   :  { %312 = vmatprep.subr.bf16.mxu0 %v1173_v25 }
  0x69   :  { %313 = vmatpush1.bf16.msra.mxu0 %v1175_v26 }
  0x6a   :  { %314 = vmatprep.subr.bf16.mxu0 %v1176_v27 }
  0x6d   :  { %315 = vmatpush1.bf16.msra.mxu0 %v1178_v28 }
  0x6e   :  { %316 = vmatprep.subr.bf16.mxu0 %v1179_v29 }
  0x71   :  { %317 = vmatpush1.bf16.msra.mxu0 %v1181_v30 }
  0x72   :  { %318 = vmatprep.subr.bf16.mxu0 %v1182_v31 }
  0x75   :  { %319 = vmatpush1.bf16.msra.mxu0 %v1184_v32 }
  0x78   :  { %321 = vmatmul.mubr.bf16.vlgmr.msra.gmra.mrb[0].mxu0 %v1185_v33 }
 0x14b   :  { %v322_v41 = vpop.f32.mrb[0].mxu0 }
 0x14c   :  { %v1505_v42 = vadd.f32 %v322_v41, %v111_v39  ;;  %v324_v43 = vpop.f32.mrb[1].mxu0 }
 0x14d   :  { %v1507_v44 = vadd.f32 %v324_v43, %v115_v40  ;;  %v326_v45 = vpop.f32.mrb[2].mxu0 }
 0x14e   :  { %v1510_v46 = vmul.f32 0.70710677, %v1505_v42  ;;  %v1512_v47 = vadd.f32 %v326_v45, %v111_v39  ;;  %v328_v48 = vpop.f32.mrb[3].mxu0 }
 0x14f   :  { %v1515_v49 = vmul.f32 0.70710677, %v1507_v44  ;;  %v1517_v50 = vadd.f32 %v328_v48, %v115_v40 }
 0x150   :  { %v347_v51 = vand.u32 2147483647, %v1510_v46  ;;  %v1521_v52 = vmul.f32 0.70710677, %v1512_v47  ;;  %vm339_vm0 = vcmp.ge.f32.partialorder %v1510_v46, 0.0 }
 0x151   :  { %v348_v53 = vand.u32 2147483647, %v1515_v49  ;;  %v1525_v54 = vmul.f32 0.70710677, %v1517_v50  ;;  %vm340_vm1 = vcmp.ge.f32.partialorder %v1515_v49, 0.0 }
 0x152   :  { %v351_v55 = vmul.f32 0.3275911, %v347_v51  ;;  %v349_v56 = vand.u32 2147483647, %v1521_v52  ;;  %v403_v1 = vsub.f32 0.0, %v347_v51  ;;  %vm341_vm2 = vcmp.ge.f32.partialorder %v1521_v52, 0.0 }
 0x153   :  { %v352_v57 = vmul.f32 0.3275911, %v348_v53  ;;  %v350_v61 = vand.u32 2147483647, %v1525_v54  ;;  %v404_v2 = vsub.f32 0.0, %v348_v53  ;;  %vm342_vm3 = vcmp.ge.f32.partialorder %v1525_v54, 0.0 }
 0x154   :  { %v355_v58 = vadd.f32 1.0, %v351_v55  ;;  %v353_v59 = vmul.f32 0.3275911, %v349_v56  ;;  %v407_v4 = vmul.f32 %v403_v1, %v347_v51  ;;  %v405_v5 = vsub.f32 0.0, %v349_v56 }
 0x155   :  { %v356_v60 = vadd.f32 1.0, %v352_v57  ;;  %v354_v63 = vmul.f32 0.3275911, %v350_v61  ;;  %v408_v7 = vmul.f32 %v404_v2, %v348_v53  ;;  %v406_v9 = vsub.f32 0.0, %v350_v61 }
 0x156   :  { %1284 = vrcp.f32 %v355_v58  ;;  %v357_v62 = vadd.f32 1.0, %v353_v59  ;;  %v411_v13 = vmul.f32 1.442695, %v407_v4  ;;  %v409_v14 = vmul.f32 %v405_v5, %v349_v56 }
 0x157   :  { %1286 = vrcp.f32 %v356_v60  ;;  %v358_v0 = vadd.f32 1.0, %v354_v63  ;;  %v413_v16 = vmul.f32 1.442695, %v408_v7  ;;  %v410_v20 = vmul.f32 %v406_v9, %v350_v61 }
 0x158   :  { %1288 = vrcp.f32 %v357_v62  ;;  %v415_v25 = vmul.f32 1.442695, %v409_v14 }
 0x159   :  { %1290 = vrcp.f32 %v358_v0  ;;  %v417_v30 = vmul.f32 1.442695, %v410_v20 }
 0x15a   :  { %1292 = vpow2.f32 %v411_v13  ;;  %v331_v13 = vmul.f32 0.5, %v1505_v42  ;;  %v333_v42 = vmul.f32 0.5, %v1512_v47  ;;  %v1192_v47 = vld [vmem:[#allocation8 + $0xc] ss:$16 sps:$4 sm:$0xff]  }
 0x15b   :  { %1294 = vpow2.f32 %v413_v16  ;;  %959 = vmatprep.subr.bf16.mxu0 %v1192_v47  ;;  %v1264_v47 = vld [vmem:[#allocation8 + $0x18c] ss:$16 sps:$4 sm:$0xff]  }
 0x15c   :  { %1296 = vpow2.f32 %v415_v25 }
 0x15d   :  { %1298 = vpow2.f32 %v417_v30  ;;  %v1190_v30 = vld [vmem:[#allocation8 + $0x8] ss:$16 sps:$4 sm:$0xff]  }
 0x15e   :  { %960 = vmatpush1.bf16.msra.mxu0 %v1190_v30  ;;  %v1260_v30 = vld [vmem:[#allocation8 + $0x184] ss:$16 sps:$4 sm:$0xff]  }
 0x160   :  { %v1285_v3 = vpop.eup %1284 }
 0x161   :  { %v1287_v6 = vpop.eup %1286  ;;  %v367_v8 = vmul.f32 1.0614054, %v1285_v3 }
 0x162   :  { %v368_v10 = vmul.f32 1.0614054, %v1287_v6  ;;  %v1289_v12 = vpop.eup %1288 }
 0x163   :  { %v371_v11 = vadd.f32 -1.4531521, %v367_v8  ;;  %v369_v18 = vmul.f32 1.0614054, %v1289_v12  ;;  %v1291_v19 = vpop.eup %1290 }
 0x164   :  { %v372_v15 = vadd.f32 -1.4531521, %v368_v10  ;;  %v370_v23 = vmul.f32 1.0614054, %v1291_v19  ;;  %v1293_v58 = vpop.eup %1292 }
 0x165   :  { %v375_v17 = vmul.f32 %v1285_v3, %v371_v11  ;;  %v373_v24 = vadd.f32 -1.4531521, %v369_v18  ;;  %v1295_v60 = vpop.eup %1294 }
 0x166   :  { %v376_v21 = vmul.f32 %v1287_v6, %v372_v15  ;;  %v374_v28 = vadd.f32 -1.4531521, %v370_v23  ;;  %v1297_v5 = vpop.eup %1296 }
 0x167   :  { %v379_v22 = vadd.f32 1.4214138, %v375_v17  ;;  %v377_v29 = vmul.f32 %v1289_v12, %v373_v24  ;;  %v1299_v46 = vpop.eup %1298 }
 0x168   :  { %v380_v26 = vadd.f32 1.4214138, %v376_v21  ;;  %v378_v33 = vmul.f32 %v1291_v19, %v374_v28 }
 0x169   :  { %v383_v27 = vmul.f32 %v1285_v3, %v379_v22  ;;  %v381_v34 = vadd.f32 1.4214138, %v377_v29  ;;  %v1188_v29 = vld [vmem:[#allocation8 + $0x4] ss:$16 sps:$4 sm:$0xff]  }
 0x16a   :  { %v384_v31 = vmul.f32 %v1287_v6, %v380_v26  ;;  %v382_v40 = vadd.f32 1.4214138, %v378_v33  ;;  %916 = vmatprep.subr.bf16.mxu1 %v1188_v29  ;;  %v1198_v33 = vld [vmem:[#allocation8 + $0x2c] ss:$16 sps:$4 sm:$0xff]   ;;  %v1259_v29 = vld [vmem:[#allocation8 + $0x160] ss:$16 sps:$4 sm:$0xff]  }
 0x16b   :  { %v387_v32 = vadd.f32 -0.28449672, %v383_v27  ;;  %v385_v41 = vmul.f32 %v1289_v12, %v381_v34  ;;  %v1199_v34 = vld [vmem:[#allocation8 + $0x20] ss:$16 sps:$4 sm:$0xff]   ;;  %961 = vmatprep.subr.bf16.mxu0 %v1198_v33  ;;  %v1266_v33 = vld [vmem:[#allocation8 + $0x1a4] ss:$16 sps:$4 sm:$0xff]  }
 0x16c   :  { %v388_v37 = vadd.f32 -0.28449672, %v384_v31  ;;  %v386_v48 = vmul.f32 %v1291_v19, %v382_v40  ;;  %v1193_v31 = vld [vmem:[#allocation8] ss:$16 sps:$4 sm:$0xff]   ;;  %v1202_v40 = vld [vmem:[#allocation8 + $0x48] ss:$16 sps:$4 sm:$0xff]  }
 0x16d   :  { %v391_v39 = vmul.f32 %v1285_v3, %v387_v32  ;;  %v389_v51 = vadd.f32 -0.28449672, %v385_v41  ;;  %v1194_v32 = vld [vmem:[#allocation8 + $0x24] ss:$16 sps:$4 sm:$0xff]   ;;  %917 = vmatpush1.bf16.msra.mxu1 %v1193_v31  ;;  %v1205_v41 = vld [vmem:[#allocation8 + $0x40] ss:$16 sps:$4 sm:$0xff]  }
 0x16e   :  { %v392_v43 = vmul.f32 %v1287_v6, %v388_v37  ;;  %v390_v56 = vadd.f32 -0.28449672, %v386_v48  ;;  %918 = vmatprep.subr.bf16.mxu1 %v1194_v32  ;;  %v1200_v37 = vld [vmem:[#allocation8 + $0x44] ss:$16 sps:$4 sm:$0xff]   ;;  %v1208_v48 = vld [vmem:[#allocation8 + $0x68] ss:$16 sps:$4 sm:$0xff]  }
 0x16f   :  { %v395_v45 = vadd.f32 0.2548296, %v391_v39  ;;  %v393_v57 = vmul.f32 %v1289_v12, %v389_v51  ;;  %v1204_v39 = vld [vmem:[#allocation8 + $0x4c] ss:$16 sps:$4 sm:$0xff]   ;;  %v1211_v51 = vld [vmem:[#allocation8 + $0x60] ss:$16 sps:$4 sm:$0xff]  }
 0x170   :  { %v396_v53 = vadd.f32 0.2548296, %v392_v43  ;;  %v394_v62 = vmul.f32 %v1291_v19, %v390_v56  ;;  %v1206_v43 = vld [vmem:[#allocation8 + $0x64] ss:$16 sps:$4 sm:$0xff]   ;;  %v1214_v56 = vld [vmem:[#allocation8 + $0x88] ss:$16 sps:$4 sm:$0xff]  }
 0x171   :  { %v399_v55 = vmul.f32 %v1285_v3, %v395_v45  ;;  %v397_v63 = vadd.f32 0.2548296, %v393_v57  ;;  %v1405_v3 = vmov -1.0   ;;  %919 = vmatpush1.bf16.msra.mxu1 %v1199_v34  ;;  %v1210_v45 = vld [vmem:[#allocation8 + $0x6c] ss:$16 sps:$4 sm:$0xff]  }
 0x172   :  { %v400_v59 = vmul.f32 %v1287_v6, %v396_v53  ;;  %v398_v2 = vadd.f32 0.2548296, %v394_v62  ;;  %v343_v7 = vsel %vm339_vm0, 1.0, %v1405_v3  ;;  %v344_v9 = vsel %vm340_vm1, 1.0, %v1405_v3  ;;  %920 = vmatprep.subr.bf16.mxu1 %v1200_v37  ;;  %v1212_v53 = vld [vmem:[#allocation8 + $0x84] ss:$16 sps:$4 sm:$0xff]  }
 0x173   :  { %v419_v61 = vmul.f32 %v1293_v58, %v399_v55  ;;  %v401_v4 = vmul.f32 %v1289_v12, %v397_v63  ;;  %v332_v12 = vmul.f32 0.5, %v1507_v44  ;;  %v345_v17 = vsel %vm341_vm2, 1.0, %v1405_v3  ;;  %v1216_v55 = vld [vmem:[#allocation8 + $0x8c] ss:$16 sps:$4 sm:$0xff]   ;;  %v1217_v57 = vld [vmem:[#allocation8 + $0x80] ss:$16 sps:$4 sm:$0xff]  }
 0x174   :  { %v420_v0 = vmul.f32 %v1295_v60, %v400_v59  ;;  %v402_v10 = vmul.f32 %v1291_v19, %v398_v2  ;;  %v346_v22 = vsel %vm342_vm3, 1.0, %v1405_v3  ;;  %v334_v44 = vmul.f32 0.5, %v1517_v50  ;;  %v1196_v50 = vld [vmem:[#allocation8 + $0x28] ss:$16 sps:$4 sm:$0xff]   ;;  %v1218_v58 = vld [vmem:[#allocation8 + $0xa4] ss:$16 sps:$4 sm:$0xff]  }
 0x175   :  { %v423_v1 = vsub.f32 1.0, %v419_v61  ;;  %v421_v11 = vmul.f32 %v1297_v5, %v401_v4  ;;  %962 = vmatpush1.bf16.msra.mxu0 %v1196_v50  ;;  %921 = vmatpush1.bf16.msra.mxu1 %v1205_v41  ;;  %v1222_v59 = vld [vmem:[#allocation8 + $0xac] ss:$16 sps:$4 sm:$0xff]   ;;  %v1220_v60 = vld [vmem:[#allocation8 + $0xa8] ss:$16 sps:$4 sm:$0xff]  }
 0x176   :  { %v424_v8 = vsub.f32 1.0, %v420_v0  ;;  %v422_v15 = vmul.f32 %v1299_v46, %v402_v10  ;;  %963 = vmatprep.subr.bf16.mxu0 %v1204_v39  ;;  %922 = vmatprep.subr.bf16.mxu1 %v1206_v43  ;;  %v1223_v61 = vld [vmem:[#allocation8 + $0xa0] ss:$16 sps:$4 sm:$0xff]   ;;  %v1224_v62 = vld [vmem:[#allocation8 + $0xc4] ss:$16 sps:$4 sm:$0xff]  }
 0x177   :  { %v427_v6 = vmul.f32 %v423_v1, %v343_v7  ;;  %v425_v16 = vsub.f32 1.0, %v421_v11  ;;  %v1228_v63 = vld [vmem:[#allocation8 + $0xcc] ss:$16 sps:$4 sm:$0xff]   ;;  %v1226_v0 = vld [vmem:[#allocation8 + $0xc8] ss:$16 sps:$4 sm:$0xff]  }
 0x178   :  { %v428_v14 = vmul.f32 %v424_v8, %v344_v9  ;;  %v426_v21 = vsub.f32 1.0, %v422_v15  ;;  %v1229_v1 = vld [vmem:[#allocation8 + $0xc0] ss:$16 sps:$4 sm:$0xff]   ;;  %v1230_v2 = vld [vmem:[#allocation8 + $0xe4] ss:$16 sps:$4 sm:$0xff]  }
 0x179   :  { %v431_v49 = vadd.f32 1.0, %v427_v6  ;;  %v429_v19 = vmul.f32 %v425_v16, %v345_v17  ;;  %964 = vmatpush1.bf16.msra.mxu0 %v1202_v40  ;;  %923 = vmatpush1.bf16.msra.mxu1 %v1211_v51  ;;  %v1234_v4 = vld [vmem:[#allocation8 + $0xec] ss:$16 sps:$4 sm:$0xff]   ;;  %v1232_v5 = vld [vmem:[#allocation8 + $0xe8] ss:$16 sps:$4 sm:$0xff]  }
 0x17a   :  { %v432_v18 = vadd.f32 1.0, %v428_v14  ;;  %v430_v24 = vmul.f32 %v426_v21, %v346_v22  ;;  %965 = vmatprep.subr.bf16.mxu0 %v1210_v45  ;;  %924 = vmatprep.subr.bf16.mxu1 %v1212_v53  ;;  %v1235_v3 = vld [vmem:[#allocation8 + $0xe0] ss:$16 sps:$4 sm:$0xff]   ;;  %v1236_v7 = vld [vmem:[#allocation8 + $0x104] ss:$16 sps:$4 sm:$0xff]  }
 0x17b   :  { %v1537_v20 = vmul.f32 %v431_v49, %v331_v13  ;;  %v433_v54 = vadd.f32 1.0, %v429_v19  ;;  %v1240_v8 = vld [vmem:[#allocation8 + $0x10c] ss:$16 sps:$4 sm:$0xff]   ;;  %v1238_v9 = vld [vmem:[#allocation8 + $0x108] ss:$16 sps:$4 sm:$0xff]  }
 0x17c   :  { %v1539_v23 = vmul.f32 %v432_v18, %v332_v12  ;;  %v434_v26 = vadd.f32 1.0, %v430_v24  ;;  %v1241_v6 = vld [vmem:[#allocation8 + $0x100] ss:$16 sps:$4 sm:$0xff]   ;;  %v1242_v22 = vld [vmem:[#allocation8 + $0x124] ss:$16 sps:$4 sm:$0xff]  }
 0x17d   :  { %v1545_v52 = vmul.f32 %v433_v54, %v333_v42  ;;  %966 = vmatpush1.bf16.msra.mxu0 %v1208_v48  ;;  %925 = vmatpush1.bf16.msra.mxu1 %v1217_v57  ;;  %v1246_v42 = vld [vmem:[#allocation8 + $0x12c] ss:$16 sps:$4 sm:$0xff]   ;;  %v1247_v24 = vld [vmem:[#allocation8 + $0x120] ss:$16 sps:$4 sm:$0xff]   ;;  %v1248_v54 = vld [vmem:[#allocation8 + $0x144] ss:$16 sps:$4 sm:$0xff]  }
 0x17e   :  { %v439_v25 = vadd.f32 %v1539_v23, %v1537_v20  ;;  %v1547_v27 = vmul.f32 %v434_v26, %v334_v44  ;;  %967 = vmatprep.subr.bf16.mxu0 %v1216_v55  ;;  %926 = vmatprep.subr.bf16.mxu1 %v1218_v58  ;;  %v1252_v44 = vld [vmem:[#allocation8 + $0x14c] ss:$16 sps:$4 sm:$0xff]   ;;  %v1253_v26 = vld [vmem:[#allocation8 + $0x140] ss:$16 sps:$4 sm:$0xff]   ;;  %v1262_v31 = vld [vmem:[#allocation8 + $0x188] ss:$16 sps:$4 sm:$0xff]  }
 0x17f   :  { %v1265_v32 = vld [vmem:[#allocation8 + $0x180] ss:$16 sps:$4 sm:$0xff]   ;;  %v1270_v50 = vld [vmem:[#allocation8 + $0x1ac] ss:$16 sps:$4 sm:$0xff]   ;;  %v1268_v34 = vld [vmem:[#allocation8 + $0x1a8] ss:$16 sps:$4 sm:$0xff]  }
 0x180   :  { %440 = vadd.xlane.f32.xlu0 %v439_v25  ;;  %v442_v28 = vadd.f32 %v1547_v27, %v1545_v52  ;;  %v1250_v25 = vld [vmem:[#allocation8 + $0x148] ss:$16 sps:$4 sm:$0xff]   ;;  %v1271_v37 = vld [vmem:[#allocation8 + $0x1a0] ss:$16 sps:$4 sm:$0xff]   ;;  %v1272_v39 = vld [vmem:[#allocation8 + $0x1c4] ss:$16 sps:$4 sm:$0xff]  }
 0x181   :  { %968 = vmatpush1.bf16.msra.mxu0 %v1214_v56  ;;  %927 = vmatpush1.bf16.msra.mxu1 %v1223_v61  ;;  %v1276_v40 = vld [vmem:[#allocation8 + $0x1cc] ss:$16 sps:$4 sm:$0xff]   ;;  %v1274_v41 = vld [vmem:[#allocation8 + $0x1c8] ss:$16 sps:$4 sm:$0xff]   ;;  %v1277_v43 = vld [vmem:[#allocation8 + $0x1c0] ss:$16 sps:$4 sm:$0xff]  }
 0x182   :  { %969 = vmatprep.subr.bf16.mxu0 %v1222_v59  ;;  %928 = vmatprep.subr.bf16.mxu1 %v1224_v62  ;;  %v1278_v45 = vld [vmem:[#allocation8 + $0x1e4] ss:$16 sps:$4 sm:$0xff]   ;;  %v1282_v48 = vld [vmem:[#allocation8 + $0x1ec] ss:$16 sps:$4 sm:$0xff]   ;;  %v1280_v51 = vld [vmem:[#allocation8 + $0x1e8] ss:$16 sps:$4 sm:$0xff]  }
 0x183   :  { %v1283_v53 = vld [vmem:[#allocation8 + $0x1e0] ss:$16 sps:$4 sm:$0xff]  }
 0x184   :  { %443 = vadd.xlane.f32.xlu0 %v442_v28  ;;  %v1256_v28 = vld [vmem:[#allocation8 + $0x168] ss:$16 sps:$4 sm:$0xff]   ;;  %v472_v61 = vld [vmem:[%s1607_s3] sm:$0x3] }
 0x185   :  { %970 = vmatpush1.bf16.msra.mxu0 %v1220_v60  ;;  %929 = vmatpush1.bf16.msra.mxu1 %v1229_v1  ;;  %v481_v1 = vrot.slane %v472_v61, %v1501_v38 }
 0x186   :  { %971 = vmatprep.subr.bf16.mxu0 %v1228_v63  ;;  %930 = vmatprep.subr.bf16.mxu1 %v1230_v2  ;;  %v488_v2 = vld [vmem:[%s1608_s4] sm:$0x3] }
 0x189   :  { %972 = vmatpush1.bf16.msra.mxu0 %v1226_v0  ;;  %931 = vmatpush1.bf16.msra.mxu1 %v1235_v3  ;;  %v477_v0 = vrot.slane %v472_v61, %v1495_v36  ;;  %v493_v3 = vrot.slane %v488_v2, %v1495_v36 }
 0x18a   :  { %973 = vmatprep.subr.bf16.mxu0 %v1234_v4  ;;  %932 = vmatprep.subr.bf16.mxu1 %v1236_v7  ;;  %v497_v7 = vrot.slane %v488_v2, %v1501_v38 }
 0x18d   :  { %974 = vmatpush1.bf16.msra.mxu0 %v1232_v5  ;;  %933 = vmatpush1.bf16.msra.mxu1 %v1241_v6 }
 0x18e   :  { %975 = vmatprep.subr.bf16.mxu0 %v1240_v8  ;;  %934 = vmatprep.subr.bf16.mxu1 %v1242_v22 }
 0x191   :  { %976 = vmatpush1.bf16.msra.mxu0 %v1238_v9  ;;  %935 = vmatpush1.bf16.msra.mxu1 %v1247_v24 }
 0x192   :  { %977 = vmatprep.subr.bf16.mxu0 %v1246_v42  ;;  %936 = vmatprep.subr.bf16.mxu1 %v1248_v54 }
 0x195   :  { %937 = vmatpush1.bf16.msra.mxu1 %v1253_v26 }
 0x20d   :  { %v441_v10 = vpop.xlane.xlu0 %440 }
 0x20e   :  { %v446_v11 = vmul.f32 0.00390625, %v441_v10 }
 0x210   :  { %v1552_v46 = vsub.f32 %v1537_v20, %v446_v11  ;;  %v1555_v13 = vsub.f32 %v1539_v23, %v446_v11  ;;  %v1244_v23 = vld [vmem:[#allocation8 + $0x128] ss:$16 sps:$4 sm:$0xff]  }
 0x211   :  { %v444_v14 = vpop.xlane.xlu0 %443  ;;  %978 = vmatpush1.bf16.msra.mxu0 %v1244_v23 }
 0x212   :  { %v452_v49 = vmul.f32 %v1552_v46, %v1552_v46  ;;  %v453_v15 = vmul.f32 %v1555_v13, %v1555_v13  ;;  %v447_v16 = vmul.f32 0.00390625, %v444_v14  ;;  %979 = vmatprep.subr.bf16.mxu0 %v1252_v44 }
 0x214   :  { %v456_v12 = vadd.f32 %v453_v15, %v452_v49  ;;  %v1562_v17 = vsub.f32 %v1545_v52, %v447_v16  ;;  %v1565_v18 = vsub.f32 %v1547_v27, %v447_v16  ;;  %v1254_v52 = vld [vmem:[#allocation8 + $0x164] ss:$16 sps:$4 sm:$0xff]   ;;  %v1258_v27 = vld [vmem:[#allocation8 + $0x16c] ss:$16 sps:$4 sm:$0xff]  }
 0x215   :  { %980 = vmatpush1.bf16.msra.mxu0 %v1250_v25  ;;  %938 = vmatprep.subr.bf16.mxu1 %v1254_v52 }
 0x216   :  { %457 = vadd.xlane.f32.xlu1 %v456_v12  ;;  %v454_v20 = vmul.f32 %v1562_v17, %v1562_v17  ;;  %v455_v21 = vmul.f32 %v1565_v18, %v1565_v18  ;;  %981 = vmatprep.subr.bf16.mxu0 %v1258_v27 }
 0x217   :  { %939 = vmatpush1.bf16.msra.mxu1 %v1259_v29 }
 0x218   :  { %v459_v19 = vadd.f32 %v455_v21, %v454_v20  ;;  %940 = vmatprep.subr.bf16.mxu1 %v1260_v30 }
 0x219   :  { %982 = vmatpush1.bf16.msra.mxu0 %v1256_v28 }
 0x21a   :  { %460 = vadd.xlane.f32.xlu1 %v459_v19  ;;  %983 = vmatprep.subr.bf16.mxu0 %v1264_v47 }
 0x21b   :  { %941 = vmatpush1.bf16.msra.mxu1 %v1265_v32 }
 0x21c   :  { %942 = vmatprep.subr.bf16.mxu1 %v1266_v33 }
 0x21d   :  { %984 = vmatpush1.bf16.msra.mxu0 %v1262_v31 }
 0x21e   :  { %985 = vmatprep.subr.bf16.mxu0 %v1270_v50 }
 0x21f   :  { %943 = vmatpush1.bf16.msra.mxu1 %v1271_v37 }
 0x220   :  { %944 = vmatprep.subr.bf16.mxu1 %v1272_v39 }
 0x221   :  { %986 = vmatpush1.bf16.msra.mxu0 %v1268_v34 }
 0x222   :  { %987 = vmatprep.subr.bf16.mxu0 %v1276_v40 }
 0x223   :  { %945 = vmatpush1.bf16.msra.mxu1 %v1277_v43 }
 0x224   :  { %946 = vmatprep.subr.bf16.mxu1 %v1278_v45 }
 0x225   :  { %988 = vmatpush1.bf16.msra.mxu0 %v1274_v41 }
 0x226   :  { %989 = vmatprep.subr.bf16.mxu0 %v1282_v48 }
 0x227   :  { %947 = vmatpush1.bf16.msra.mxu1 %v1283_v53 }
 0x229   :  { %990 = vmatpush1.bf16.msra.mxu0 %v1280_v51 }
 0x2a3   :  { %v458_v55 = vpop.xlane.xlu1 %457 }
 0x2a4   :  { %v462_v56 = vmul.f32 0.00390625, %v458_v55 }
 0x2a6   :  { %v464_v57 = vadd.f32 1e-05, %v462_v56 }
 0x2a7   :  { %v461_v58 = vpop.xlane.xlu1 %460 }
 0x2a8   :  { %1300 = vrsqrt.f32 %v464_v57  ;;  %v463_v59 = vmul.f32 0.00390625, %v461_v58 }
 0x2aa   :  { %v465_v60 = vadd.f32 1e-05, %v463_v59 }
 0x2ac   :  { %1302 = vrsqrt.f32 %v465_v60 }
 0x2b2   :  { %v1301_v62 = vpop.eup %1300 }
 0x2b3   :  { %v469_v63 = vmul.f32 %v1301_v62, %v1555_v13  ;;  %v468_v4 = vmul.f32 %v1301_v62, %v1552_v46  ;;  %v586_v46 = vsub.s32 2, %v1492_v35 }
 0x2b5   :  { %v485_v9 = vmul.f32 %v481_v1, %v469_v63  ;;  %v484_v10 = vmul.f32 %v477_v0, %v468_v4 }
 0x2b6   :  { %v1303_v5 = vpop.eup %1302 }
 0x2b7   :  { %v471_v8 = vmul.f32 %v1303_v5, %v1565_v18  ;;  %v470_v6 = vmul.f32 %v1303_v5, %v1562_v17  ;;  %v501_v14 = vadd.f32 %v497_v7, %v485_v9  ;;  %v500_v15 = vadd.f32 %v493_v3, %v484_v10  ;;  %v574_v18 = vld [vmem:[%s1610_s6] sm:$0xf]  ;;  %s1370_s6 = scalar_lea.vmem %s1016_s21, 1024 }
 0x2b8   :  { %v590_v17 = vsub.s32 3, %v1492_v35  ;;  %v579_v21 = vrot.slane %v574_v18, %v1495_v36  ;;  %v587_v19 = vrot.slane %v574_v18, %v586_v46  ;;  %v583_v22 = vrot.slane %v574_v18, %v1501_v38  ;;  %p1371_p10 = scmp.ne.s32.totalorder %s1016_s21, %s1370_s6  ;;  %p1376_p12 = scmp.lt.s32.totalorder %s1370_s6, %s1370_s6 }
 0x2b9   :  { %v487_v11 = vmul.f32 %v481_v1, %v471_v8  ;;  %v486_v13 = vmul.f32 %v477_v0, %v470_v6 }
 0x2ba   :  { %v591_v23 = vrot.slane %v574_v18, %v590_v17  ;;  %p1377_p13 = por %p1376_p12, %p1375_p11 }
 0x2bb   :  { %v503_v49 = vadd.f32 %v497_v7, %v487_v11  ;;  %v502_v16 = vadd.f32 %v493_v3, %v486_v13 }
 0x2bc   :  { %p1378_p0 = pnand %p1377_p13, %p1371_p10 }
 0x2bd   :  { %v505_v12 = vpack.c.bf16 %v503_v49, %v501_v14  ;;  %v504_v20 = vpack.c.bf16 %v502_v16, %v500_v15 }
 0x2bf   :  { %948 = vmatprep.mubr.bf16.mxu1 %v505_v12  ;;  %991 = vmatprep.mubr.bf16.mxu0 %v505_v12 }
 0x2c0   :  { %949 = vmatmul.mubr.bf16.vlgmr.msra.gmra.mrb[0].mxu1 %v504_v20  ;;  %992 = vmatmul.mubr.bf16.vlgmr.msra.gmra.mrb[4].mxu0 %v504_v20 }
 0x393   :  { %v950_v42 = vpop.f32.mrb[0].mxu1  ;;  %v993_v24 = vpop.f32.mrb[4].mxu0 }
 0x394   :  { %v951_v54 = vadd.f32 %v950_v42, %v579_v21  ;;  %v994_v25 = vadd.f32 %v993_v24, %v587_v19  ;;  %v952_v44 = vpop.f32.mrb[1].mxu1  ;;  %v995_v26 = vpop.f32.mrb[5].mxu0 }
 0x395   :  { %v953_v52 = vadd.f32 %v952_v44, %v583_v22  ;;  %v996_v27 = vadd.f32 %v995_v26, %v591_v23  ;;  %v954_v28 = vpop.f32.mrb[2].mxu1  ;;  %v997_v29 = vpop.f32.mrb[6].mxu0 }
 0x396   :  { %1002 = vst [vmem:[#allocation9] sm:$0xff] %v951_v54  ;;  %1004 = vst [vmem:[#allocation9 + $0x10] sm:$0xff] %v994_v25  ;;  %v955_v35 = vadd.f32 %v954_v28, %v579_v21  ;;  %v998_v36 = vadd.f32 %v997_v29, %v587_v19  ;;  %v956_v30 = vpop.f32.mrb[3].mxu1  ;;  %v999_v47 = vpop.f32.mrb[7].mxu0 }
 0x397   :  { %1003 = vst [vmem:[#allocation9 + $0x8] sm:$0xff] %v953_v52  ;;  %1005 = vst [vmem:[#allocation9 + $0x18] sm:$0xff] %v996_v27  ;;  %v957_v38 = vadd.f32 %v956_v30, %v583_v22  ;;  %v1000_v31 = vadd.f32 %v999_v47, %v591_v23 }
 0x398   :  { %1006 = vst [vmem:[#allocation9 + $0x20] sm:$0xff] %v955_v35  ;;  %1008 = vst [vmem:[#allocation9 + $0x30] sm:$0xff] %v998_v36 }
 0x399   :  { %1007 = vst [vmem:[#allocation9 + $0x28] sm:$0xff] %v957_v38  ;;  %1009 = vst [vmem:[#allocation9 + $0x38] sm:$0xff] %v1000_v31 }
 0x39a   :  { %1381 = shalt.err (!%p1378_p0)
}
 0x39b   :  { %s1382_s24 = scalar_lea.hbm %s1611_s7, 1024 }
 0x39c   :  { %p1383_p1 = scmp.ne.s32.totalorder %s1611_s7, %s1382_s24  ;;  %p1386_p2 = scmp.lt.u32.totalorder %s1382_s24, %s1611_s7 }
 0x39e   :  { %p1388_p3 = pnand %p1386_p2, %p1383_p1 }
 0x3a0   :  { %1391 = shalt.err (!%p1388_p3)
}
 0x3a1   :  { %s1407_s29 = smov 512   ;;  %s1408_s30 = smov 32  }
 0x3a2   :  { %1021 = dma.vmem_to_hbm [thread:$0]  %s1016_s21, 1024, %s1611_s7, [#allocation5], %s1407_s29, %s1407_s29, %s1408_s30  }
 0x3a3   :  { %1396 = dma.done.wait [#allocation5], 1024  }
 0x3a4   :  { %1397 = vsyncadd [#allocation5], 4294966272 }
 0x3a5   :  { %1025 = vsyncpa [#allocation4], 1 }
 0x3a6   :  { %1026 = vsyncpa [#allocation7], 1 }
 0x3a7   :  { %1027 = vsyncpa [#allocation5], 1 }

</bundles_post_ra>
